<compile_context>
chip_gen: v6e
topology: v6e:2x2x1
jax: 0.10.0
libtpu: 0.0.40
codegen_flags: <defaults>
</compile_context>

<pallas_src>
import functools

import jax
import jax.numpy as jnp
import numpy as np
from jax import lax
from jax.experimental import pallas as pl
from jax.experimental.pallas import tpu as pltpu

_LANES = 128


def _round_up(a, b):
    return ((a + b - 1) // b) * b


def _channel_attention_kernel(x_ref, w1_ref, w2_ref, o_ref, sum_acc, max_acc,
                              *, true_s, s_tile, needs_mask):
    # x_ref  : (C, s_tile)      one spatial tile of one batch element (native dtype)
    # w1_ref : (C_r, C)         fc[0] weight (Conv3d C->C//r, k=1, no bias)
    # w2_ref : (C, C_r)         fc[2] weight (Conv3d C//r->C, k=1, no bias)
    # o_ref  : (1, C)           lane-dense sigmoid output row
    # sum_acc: (2, C, 128) f32  two interleaved running-sum chains
    # max_acc: (2, C, 128)      two interleaved running-max chains (native dtype)
    # TODO(synk): -inf fill assumes floating-point inputs (true for this module);
    #             integer inputs would need a dtype-min fill instead.
    s_idx = pl.program_id(1)
    num_s = pl.num_programs(1)
    c = x_ref.shape[0]
    neg_fill = jnp.array(-jnp.inf, dtype=max_acc.dtype)
    n_chunks = s_tile // _LANES
    n_pairs = n_chunks // 2
    leftover = n_chunks - 2 * n_pairs  # 0 or 1

    @pl.when(s_idx == 0)
    def _init():
        sum_acc[...] = jnp.zeros_like(sum_acc)
        max_acc[...] = jnp.full(max_acc.shape, neg_fill, dtype=max_acc.dtype)

    def chunk_at(idx):
        start = idx * _LANES
        if not isinstance(start, int):
            start = pl.multiple_of(start, _LANES)
        return x_ref[:, pl.ds(start, _LANES)]

    def accumulate(masked):
        # hoisted once per (masked) tile, not per chunk
        lane = lax.broadcasted_iota(jnp.int32, (c, _LANES), 1) if masked else None
        tile_base = s_idx * s_tile

        def update(s, m, ch, chunk_off):
            if masked:
                keep = lane < (true_s - (tile_base + chunk_off))
                s = s + jnp.where(keep, ch, 0).astype(jnp.float32)
                m = jnp.maximum(m, jnp.where(keep, ch, neg_fill))
            else:
                s = s + ch.astype(jnp.float32)
                m = jnp.maximum(m, ch)
            return s, m

        def body(j, carry):
            s0, s1, m0, m1 = carry
            c0 = chunk_at(2 * j)
            c1 = chunk_at(2 * j + 1)
            s0, m0 = update(s0, m0, c0, 2 * j * _LANES)
            s1, m1 = update(s1, m1, c1, (2 * j + 1) * _LANES)
            return s0, s1, m0, m1

        carry = (sum_acc[0], sum_acc[1], max_acc[0], max_acc[1])
        if n_pairs > 0:
            if n_pairs <= 8:
                for j in range(n_pairs):           # short loops: fully unrolled
                    carry = body(j, carry)
            else:
                carry = lax.fori_loop(0, n_pairs, body, carry, unroll=8)
        s0, s1, m0, m1 = carry
        if leftover:
            cl = chunk_at(n_chunks - 1)
            s0, m0 = update(s0, m0, cl, (n_chunks - 1) * _LANES)
        sum_acc[0] = s0
        sum_acc[1] = s1
        max_acc[0] = m0
        max_acc[1] = m1

    if needs_mask:
        # mask only where it can matter: the last spatial tile
        @pl.when(s_idx < num_s - 1)
        def _hot():
            accumulate(masked=False)

        @pl.when(s_idx == num_s - 1)
        def _tail():
            accumulate(masked=True)
    else:
        accumulate(masked=False)

    @pl.when(s_idx == num_s - 1)
    def _finalize():
        # single cross-lane reductions + tiny shared MLP, once per batch element
        total = sum_acc[0] + sum_acc[1]                                   # (C,128)
        avg = jnp.sum(total, axis=-1, keepdims=True) * (1.0 / true_s)     # (C,1)
        mx = jnp.max(jnp.maximum(max_acc[0], max_acc[1]),
                     axis=-1, keepdims=True).astype(jnp.float32)          # (C,1)
        pooled = jnp.concatenate([avg, mx], axis=1)                        # (C,2)
        h = jnp.dot(w1_ref[...].astype(jnp.float32), pooled,
                    preferred_element_type=jnp.float32)                    # (C_r,2)
        h = jnp.maximum(h, 0.0)                                            # ReLU
        y = jnp.dot(w2_ref[...].astype(jnp.float32), h,
                    preferred_element_type=jnp.float32)                    # (C,2)
        logits = y[:, 0] + y[:, 1]                                         # fc(avg)+fc(max)
        o_ref[...] = jax.nn.sigmoid(logits).astype(o_ref.dtype)[None, :]


def channel_attention(x, w1, w2, *, s_tile=None):
    """x: (N, C, D, H, W); w1: (C//r, C); w2: (C, C//r) -> (N, C, 1, 1, 1)."""
    N, C, D, H, W = x.shape
    C_r = w1.shape[0]
    S = D * H * W
    x_item = jnp.dtype(x.dtype).itemsize
    w_item = jnp.dtype(w1.dtype).itemsize

    # generation-aware sizing (v5e/v6e: 128 MiB VMEM; v7x: 64 MiB)
    try:
        vmem_cap = int(pltpu.get_tpu_info().vmem_capacity_bytes)
    except Exception:
        vmem_cap = 128 << 20
    target_tile_bytes = (6 << 20) if vmem_cap >= (96 << 20) else (3 << 20)

    x_flat = x.reshape(N, C, S)
    S_eff = S
    if S < _LANES:
        # tiny spatial extent: pad once (negligible) so the single block is full-lane
        S_eff = _LANES
        x_flat = jnp.pad(x_flat, ((0, 0), (0, 0), (0, _LANES - S)))

    # largest tile that does not exceed the array extent (ragged tail handled by a
    # partial boundary block + in-kernel masking; no full-tensor jnp.pad copy)
    s_cap = (S_eff // _LANES) * _LANES
    if s_tile is None:
        budget = max(_LANES, (target_tile_bytes // max(1, C * x_item)) // _LANES * _LANES)
        s_tile = min(budget, s_cap)
    else:
        s_tile = min(_round_up(s_tile, _LANES), s_cap)
    s_tile = max(_LANES, s_tile)
    num_s = pl.cdiv(S_eff, s_tile)
    needs_mask = (S % s_tile) != 0

    vmem_need = (2 * C * s_tile * x_item               # double-buffered x tile
                 + 2 * 2 * C_r * C * w_item            # (double-buffered) weights
                 + 2 * C * _LANES * (4 + x_item)       # dual-chain accumulators
                 + 4 * C * x_item)                     # output row
    cap = int(min(vmem_cap * 3 // 4, 96 << 20))
    vmem_limit = int(min(cap, max(16 << 20, vmem_need + (8 << 20))))

    cost = pl.CostEstimate(
        flops=2 * N * C * S + 8 * N * C * C_r,          # pooling + tiny MLP
        transcendentals=N * C,                          # sigmoid
        bytes_accessed=N * C * S * x_item + 2 * C_r * C * w_item + N * C * x_item,
    )

    kernel = functools.partial(_channel_attention_kernel,
                               true_s=S, s_tile=s_tile, needs_mask=needs_mask)

    out = pl.pallas_call(
        kernel,
        out_shape=jax.ShapeDtypeStruct((N, 1, C), x.dtype),
        grid_spec=pltpu.PrefetchScalarGridSpec(
            num_scalar_prefetch=0,
            grid=(N, num_s),
            in_specs=[
                pl.BlockSpec((None, C, s_tile), lambda n, s: (n, 0, s)),
                pl.BlockSpec((C_r, C), lambda n, s: (0, 0)),
                pl.BlockSpec((C, C_r), lambda n, s: (0, 0)),
            ],
            out_specs=pl.BlockSpec((None, 1, C), lambda n, s: (n, 0, 0)),
            scratch_shapes=[
                pltpu.VMEM((2, C, _LANES), jnp.float32),   # running sums (f32)
                pltpu.VMEM((2, C, _LANES), x.dtype),       # running maxes (native)
            ],
        ),
        compiler_params=pltpu.CompilerParams(
            dimension_semantics=("parallel", "arbitrary"),
            vmem_limit_bytes=vmem_limit,
        ),
        cost_estimate=cost,
    )(x_flat, w1, w2)
    return out.reshape(N, C, 1, 1, 1)


def channel_attention_ref(x, w1, w2):
    # pure-JAX reference mirroring the PyTorch module
    avg = jnp.mean(x, axis=(2, 3, 4))                              # (N, C)
    mx = jnp.max(x, axis=(2, 3, 4))                                # (N, C)

    def fc(p):                                                     # p: (N, C)
        h = jnp.maximum(p @ w1.T, 0.0)                             # (N, C_r)
        return h @ w2.T                                            # (N, C)

    out = jax.nn.sigmoid(fc(avg) + fc(mx))
    return out[:, :, None, None, None]


if __name__ == "__main__":
    # in_planes=32, ratio=16 -> hidden = 2
    N, C, ratio = 2, 32, 16
    C_r = C // ratio

    key = jax.random.PRNGKey(0)
    kx1, k1, k2, kx2, kx3 = jax.random.split(key, 5)
    # deterministic synthetic weights (Conv3d kernels with k=1 squeezed to 2D)
    w1 = jax.random.normal(k1, (C_r, C), dtype=jnp.float32) * (1.0 / np.sqrt(C))
    w2 = jax.random.normal(k2, (C, C_r), dtype=jnp.float32) * (1.0 / np.sqrt(C_r))

    # case 1: S = 512, tile 256 -> two unmasked tiles (cross-tile accumulation path)
    x1 = jax.random.normal(kx1, (N, C, 8, 8, 8), dtype=jnp.float32)
    o1 = jax.block_until_ready(channel_attention(x1, w1, w2, s_tile=256))
    r1 = channel_attention_ref(x1, w1, w2)
    assert o1.shape == (N, C, 1, 1, 1)
    np.testing.assert_allclose(np.asarray(o1), np.asarray(r1), rtol=1e-5, atol=1e-5)

    # case 2: ragged S = 180, default tiling -> partial boundary block, masked last tile
    x2 = jax.random.normal(kx2, (N, C, 3, 6, 10), dtype=jnp.float32)
    o2 = jax.block_until_ready(channel_attention(x2, w1, w2))
    r2 = channel_attention_ref(x2, w1, w2)
    np.testing.assert_allclose(np.asarray(o2), np.asarray(r2), rtol=1e-5, atol=1e-5)

    # case 3: ragged multi-tile S = 320, tile 128 -> hot (unmasked) + tail (masked) paths
    x3 = jax.random.normal(kx3, (N, C, 5, 8, 8), dtype=jnp.float32)
    o3 = jax.block_until_ready(channel_attention(x3, w1, w2, s_tile=128))
    r3 = channel_attention_ref(x3, w1, w2)
    np.testing.assert_allclose(np.asarray(o3), np.asarray(r3), rtol=1e-5, atol=1e-5)

    print("KERNEL_OK")
</pallas_src>

<mosaic_0001>
module attributes {stable_mosaic.version = 11 : i64} {
  func.func @_channel_attention_kernel(%arg0: i32, %arg1: i32, %arg2: memref<1x32x256xf32, #tpu.memory_space<vmem>>, %arg3: memref<2x32xf32, #tpu.memory_space<vmem>>, %arg4: memref<32x2xf32, #tpu.memory_space<vmem>>, %arg5: memref<1x1x32xf32, #tpu.memory_space<vmem>>, %arg6: memref<2x32x128xf32, #tpu.memory_space<vmem>>, %arg7: memref<2x32x128xf32, #tpu.memory_space<vmem>>) attributes {dimension_semantics = [#tpu.dimension_semantics<parallel>, #tpu.dimension_semantics<arbitrary>], iteration_bounds = array<i64: 2, 2>, scalar_prefetch = 0 : i64, scratch_operands = 2 : i64, tpu.core_type = #tpu.core_type<tc>, window_params = [{transform_indices = @transform_0, window_bounds = array<i64: 1, 32, 256>}, {pipeline_mode = #tpu.pipeline_mode<synchronous>, transform_indices = @transform_1, window_bounds = array<i64: 2, 32>}, {pipeline_mode = #tpu.pipeline_mode<synchronous>, transform_indices = @transform_2, window_bounds = array<i64: 32, 2>}, {transform_indices = @transform_3, window_bounds = array<i64: 1, 1, 32>}]} {
    %c0_i32 = arith.constant 0 : i32
    %0 = arith.cmpi eq, %arg1, %c0_i32 : i32
    %1 = arith.extui %0 : i1 to i32
    %cst = arith.constant 0xFF800000 : f32
    %c0_i32_0 = arith.constant 0 : i32
    %2 = arith.cmpi ne, %1, %c0_i32_0 : i32
    scf.if %2 {
      %cst_29 = arith.constant 0.000000e+00 : f32
      %34 = vector.broadcast %cst_29 : f32 to vector<2x32x128xf32>
      %c0_30 = arith.constant 0 : index
      %c0_31 = arith.constant 0 : index
      %c0_32 = arith.constant 0 : index
      %35 = vector.load %arg6[%c0_30, %c0_31, %c0_32] : memref<2x32x128xf32, #tpu.memory_space<vmem>>, vector<2x32x128xf32>
      tpu.vector_store %arg6[%c0_30, %c0_31, %c0_32], %34 {strides = array<i32>} : memref<2x32x128xf32, #tpu.memory_space<vmem>>, vector<2x32x128xf32>,
      %36 = vector.broadcast %cst : f32 to vector<2x32x128xf32>
      %c0_33 = arith.constant 0 : index
      %c0_34 = arith.constant 0 : index
      %c0_35 = arith.constant 0 : index
      %37 = vector.load %arg7[%c0_33, %c0_34, %c0_35] : memref<2x32x128xf32, #tpu.memory_space<vmem>>, vector<2x32x128xf32>
      tpu.vector_store %arg7[%c0_33, %c0_34, %c0_35], %36 {strides = array<i32>} : memref<2x32x128xf32, #tpu.memory_space<vmem>>, vector<2x32x128xf32>,
    } else {
    }
    %c0 = arith.constant 0 : index
    %c0_1 = arith.constant 0 : index
    %c0_2 = arith.constant 0 : index
    %3 = vector.load %arg6[%c0, %c0_1, %c0_2] : memref<2x32x128xf32, #tpu.memory_space<vmem>>, vector<1x32x128xf32>
    %4 = vector.shape_cast %3 : vector<1x32x128xf32> to vector<32x128xf32>
    %c1 = arith.constant 1 : index
    %c0_3 = arith.constant 0 : index
    %c0_4 = arith.constant 0 : index
    %5 = vector.load %arg6[%c1, %c0_3, %c0_4] : memref<2x32x128xf32, #tpu.memory_space<vmem>>, vector<1x32x128xf32>
    %6 = vector.shape_cast %5 : vector<1x32x128xf32> to vector<32x128xf32>
    %c0_5 = arith.constant 0 : index
    %c0_6 = arith.constant 0 : index
    %c0_7 = arith.constant 0 : index
    %7 = vector.load %arg7[%c0_5, %c0_6, %c0_7] : memref<2x32x128xf32, #tpu.memory_space<vmem>>, vector<1x32x128xf32>
    %8 = vector.shape_cast %7 : vector<1x32x128xf32> to vector<32x128xf32>
    %c1_8 = arith.constant 1 : index
    %c0_9 = arith.constant 0 : index
    %c0_10 = arith.constant 0 : index
    %9 = vector.load %arg7[%c1_8, %c0_9, %c0_10] : memref<2x32x128xf32, #tpu.memory_space<vmem>>, vector<1x32x128xf32>
    %10 = vector.shape_cast %9 : vector<1x32x128xf32> to vector<32x128xf32>
    %c0_11 = arith.constant 0 : index
    %c0_12 = arith.constant 0 : index
    %c0_13 = arith.constant 0 : index
    %11 = vector.load %arg2[%c0_11, %c0_12, %c0_13] : memref<1x32x256xf32, #tpu.memory_space<vmem>>, vector<1x32x128xf32>
    %12 = vector.shape_cast %11 : vector<1x32x128xf32> to vector<32x128xf32>
    %c0_14 = arith.constant 0 : index
    %c0_15 = arith.constant 0 : index
    %c128 = arith.constant 128 : index
    %13 = vector.load %arg2[%c0_14, %c0_15, %c128] : memref<1x32x256xf32, #tpu.memory_space<vmem>>, vector<1x32x128xf32>
    %14 = vector.shape_cast %13 : vector<1x32x128xf32> to vector<32x128xf32>
    %15 = arith.addf %4, %12 : vector<32x128xf32>
    %16 = arith.maximumf %8, %12 : vector<32x128xf32>
    %17 = arith.addf %6, %14 : vector<32x128xf32>
    %18 = arith.maximumf %10, %14 : vector<32x128xf32>
    %c0_16 = arith.constant 0 : index
    %c0_17 = arith.constant 0 : index
    %c0_18 = arith.constant 0 : index
    %19 = vector.load %arg6[%c0_16, %c0_17, %c0_18] : memref<2x32x128xf32, #tpu.memory_space<vmem>>, vector<1x32x128xf32>
    %20 = vector.shape_cast %19 : vector<1x32x128xf32> to vector<32x128xf32>
    %21 = vector.shape_cast %15 : vector<32x128xf32> to vector<1x32x128xf32>
    tpu.vector_store %arg6[%c0_16, %c0_17, %c0_18], %21 {strides = array<i32>} : memref<2x32x128xf32, #tpu.memory_space<vmem>>, vector<1x32x128xf32>,
    %c1_19 = arith.constant 1 : index
    %c0_20 = arith.constant 0 : index
    %c0_21 = arith.constant 0 : index
    %22 = vector.load %arg6[%c1_19, %c0_20, %c0_21] : memref<2x32x128xf32, #tpu.memory_space<vmem>>, vector<1x32x128xf32>
    %23 = vector.shape_cast %22 : vector<1x32x128xf32> to vector<32x128xf32>
    %24 = vector.shape_cast %17 : vector<32x128xf32> to vector<1x32x128xf32>
    tpu.vector_store %arg6[%c1_19, %c0_20, %c0_21], %24 {strides = array<i32>} : memref<2x32x128xf32, #tpu.memory_space<vmem>>, vector<1x32x128xf32>,
    %c0_22 = arith.constant 0 : index
    %c0_23 = arith.constant 0 : index
    %c0_24 = arith.constant 0 : index
    %25 = vector.load %arg7[%c0_22, %c0_23, %c0_24] : memref<2x32x128xf32, #tpu.memory_space<vmem>>, vector<1x32x128xf32>
    %26 = vector.shape_cast %25 : vector<1x32x128xf32> to vector<32x128xf32>
    %27 = vector.shape_cast %16 : vector<32x128xf32> to vector<1x32x128xf32>
    tpu.vector_store %arg7[%c0_22, %c0_23, %c0_24], %27 {strides = array<i32>} : memref<2x32x128xf32, #tpu.memory_space<vmem>>, vector<1x32x128xf32>,
    %c1_25 = arith.constant 1 : index
    %c0_26 = arith.constant 0 : index
    %c0_27 = arith.constant 0 : index
    %28 = vector.load %arg7[%c1_25, %c0_26, %c0_27] : memref<2x32x128xf32, #tpu.memory_space<vmem>>, vector<1x32x128xf32>
    %29 = vector.shape_cast %28 : vector<1x32x128xf32> to vector<32x128xf32>
    %30 = vector.shape_cast %18 : vector<32x128xf32> to vector<1x32x128xf32>
    tpu.vector_store %arg7[%c1_25, %c0_26, %c0_27], %30 {strides = array<i32>} : memref<2x32x128xf32, #tpu.memory_space<vmem>>, vector<1x32x128xf32>,
    %c1_i32 = arith.constant 1 : i32
    %31 = arith.cmpi eq, %arg1, %c1_i32 : i32
    %32 = arith.extui %31 : i1 to i32
    %c0_i32_28 = arith.constant 0 : i32
    %33 = arith.cmpi ne, %32, %c0_i32_28 : i32
    scf.if %33 {
      %c0_29 = arith.constant 0 : index
      %c0_30 = arith.constant 0 : index
      %c0_31 = arith.constant 0 : index
      %34 = vector.load %arg6[%c0_29, %c0_30, %c0_31] : memref<2x32x128xf32, #tpu.memory_space<vmem>>, vector<1x32x128xf32>
      %35 = vector.shape_cast %34 : vector<1x32x128xf32> to vector<32x128xf32>
      %c1_32 = arith.constant 1 : index
      %c0_33 = arith.constant 0 : index
      %c0_34 = arith.constant 0 : index
      %36 = vector.load %arg6[%c1_32, %c0_33, %c0_34] : memref<2x32x128xf32, #tpu.memory_space<vmem>>, vector<1x32x128xf32>
      %37 = vector.shape_cast %36 : vector<1x32x128xf32> to vector<32x128xf32>
      %38 = arith.addf %35, %37 : vector<32x128xf32>
      %cst_35 = arith.constant dense<0.000000e+00> : vector<32xf32>
      %39 = vector.multi_reduction <add>, %38, %cst_35 [1] : vector<32x128xf32> to vector<32xf32>
      %40 = vector.shape_cast %39 : vector<32xf32> to vector<32x1xf32>
      %cst_36 = arith.constant 0.001953125 : f32
      %41 = vector.broadcast %cst_36 : f32 to vector<32x1xf32>
      %42 = arith.mulf %40, %41 : vector<32x1xf32>
      %c0_37 = arith.constant 0 : index
      %c0_38 = arith.constant 0 : index
      %c0_39 = arith.constant 0 : index
      %43 = vector.load %arg7[%c0_37, %c0_38, %c0_39] : memref<2x32x128xf32, #tpu.memory_space<vmem>>, vector<1x32x128xf32>
      %44 = vector.shape_cast %43 : vector<1x32x128xf32> to vector<32x128xf32>
      %c1_40 = arith.constant 1 : index
      %c0_41 = arith.constant 0 : index
      %c0_42 = arith.constant 0 : index
      %45 = vector.load %arg7[%c1_40, %c0_41, %c0_42] : memref<2x32x128xf32, #tpu.memory_space<vmem>>, vector<1x32x128xf32>
      %46 = vector.shape_cast %45 : vector<1x32x128xf32> to vector<32x128xf32>
      %47 = arith.maximumf %44, %46 : vector<32x128xf32>
      %cst_43 = arith.constant dense<0xFF800000> : vector<32xf32>
      %48 = vector.multi_reduction <maximumf>, %47, %cst_43 [1] : vector<32x128xf32> to vector<32xf32>
      %49 = vector.shape_cast %48 : vector<32xf32> to vector<32x1xf32>
      %50 = tpu.concatenate %42, %49 in 1 : vector<32x1xf32>, vector<32x1xf32> -> vector<32x2xf32>
      %c0_44 = arith.constant 0 : index
      %c0_45 = arith.constant 0 : index
      %51 = vector.load %arg3[%c0_44, %c0_45] : memref<2x32xf32, #tpu.memory_space<vmem>>, vector<2x32xf32>
      %cst_46 = arith.constant dense<0.000000e+00> : vector<2x2xf32>
      %52 = tpu.matmul %51, %50, %cst_46 {dimension_numbers = #tpu.dot_dimension_numbers<[1], [0], [0], [1], [0, 0, 1, 1], [], []>} : vector<2x32xf32>, vector<32x2xf32>, vector<2x2xf32> -> vector<2x2xf32>
      %cst_47 = arith.constant 0.000000e+00 : f32
      %53 = vector.broadcast %cst_47 : f32 to vector<2x2xf32>
      %54 = arith.maximumf %52, %53 : vector<2x2xf32>
      %c0_48 = arith.constant 0 : index
      %c0_49 = arith.constant 0 : index
      %55 = vector.load %arg4[%c0_48, %c0_49] : memref<32x2xf32, #tpu.memory_space<vmem>>, vector<32x2xf32>
      %cst_50 = arith.constant dense<0.000000e+00> : vector<32x2xf32>
      %56 = tpu.matmul %55, %54, %cst_50 {dimension_numbers = #tpu.dot_dimension_numbers<[1], [0], [0], [1], [0, 0, 1, 1], [], []>} : vector<32x2xf32>, vector<2x2xf32>, vector<32x2xf32> -> vector<32x2xf32>
      %57 = vector.extract_strided_slice %56 {offsets = [0, 0], sizes = [32, 1], strides = [1, 1]} : vector<32x2xf32> to vector<32x1xf32>
      %58 = vector.shape_cast %57 : vector<32x1xf32> to vector<32xf32>
      %59 = vector.extract_strided_slice %56 {offsets = [0, 1], sizes = [32, 1], strides = [1, 1]} : vector<32x2xf32> to vector<32x1xf32>
      %60 = vector.shape_cast %59 : vector<32x1xf32> to vector<32xf32>
      %61 = arith.addf %58, %60 : vector<32xf32>
      %62 = arith.negf %61 : vector<32xf32>
      %63 = math.exp %62 : vector<32xf32>
      %cst_51 = arith.constant 1.000000e+00 : f32
      %64 = vector.broadcast %cst_51 : f32 to vector<32xf32>
      %65 = arith.addf %64, %63 : vector<32xf32>
      %66 = arith.divf %64, %65 : vector<32xf32>
      %67 = vector.shape_cast %66 : vector<32xf32> to vector<1x32xf32>
      %c0_52 = arith.constant 0 : index
      %c0_53 = arith.constant 0 : index
      %c0_54 = arith.constant 0 : index
      %68 = vector.load %arg5[%c0_52, %c0_53, %c0_54] : memref<1x1x32xf32, #tpu.memory_space<vmem>>, vector<1x1x32xf32>
      %69 = vector.shape_cast %68 : vector<1x1x32xf32> to vector<1x32xf32>
      %70 = vector.shape_cast %67 : vector<1x32xf32> to vector<1x1x32xf32>
      tpu.vector_store %arg5[%c0_52, %c0_53, %c0_54], %70 {strides = array<i32>} : memref<1x1x32xf32, #tpu.memory_space<vmem>>, vector<1x1x32xf32>,
    } else {
    }
    return
  }
  func.func @transform_0(%arg0: i32, %arg1: i32) -> (i32, i32, i32) {
    %c0_i32 = arith.constant 0 : i32
    %c0_i32_0 = arith.constant 0 : i32
    return %arg0, %c0_i32, %arg1 : i32, i32, i32
  }
  func.func @transform_1(%arg0: i32, %arg1: i32) -> (i32, i32) {
    %c0_i32 = arith.constant 0 : i32
    %c0_i32_0 = arith.constant 0 : i32
    %c0_i32_1 = arith.constant 0 : i32
    return %c0_i32, %c0_i32_0 : i32, i32
  }
  func.func @transform_2(%arg0: i32, %arg1: i32) -> (i32, i32) {
    %c0_i32 = arith.constant 0 : i32
    %c0_i32_0 = arith.constant 0 : i32
    %c0_i32_1 = arith.constant 0 : i32
    return %c0_i32, %c0_i32_0 : i32, i32
  }
  func.func @transform_3(%arg0: i32, %arg1: i32) -> (i32, i32, i32) {
    %c0_i32 = arith.constant 0 : i32
    %c0_i32_0 = arith.constant 0 : i32
    %c0_i32_1 = arith.constant 0 : i32
    return %arg0, %c0_i32, %c0_i32_0 : i32, i32, i32
  }
}

</mosaic_0001>

<bundles_post_ra>
// kernel: tpu_custom_call.1
= control target key start
LH: loop header
LB: loop body
LE: loop exit
PB: predicated region body
PF: predicated region fallthrough
CT: control target
= control target key end

     0   :  { %8 = vsyncpa [#allocation5], 0  ;;  %s1282_s0 = inlined_call_operand.hbm [shape: f32[2,32,512], index: 0, kind: input, shape index: {}]   ;;  %s1283_s1 = inlined_call_operand.vmem [shape: f32[2,32], index: 1, kind: input, shape index: {}]   ;;  %s1284_s2 = inlined_call_operand.vmem [shape: f32[32,2], index: 2, kind: input, shape index: {}]   ;;  %s1285_s3 = inlined_call_operand.hbm [shape: f32[2,1,32], index: 3, kind: output, shape index: {}]  }
   0x1   :  { %10 = vsyncpa [#allocation5 + $0x1], 0 }
   0x2   :  { %11 = vsyncpa [#allocation6], 0 }
   0x3   :  { %13 = vsyncpa [#allocation6 + $0x1], 0  ;;  %s1065_s12 = smov 0   ;;  %s1067_s13 = smov 0  }
   0x4   :  { %s1069_s14 = smov 0   ;;  %s1071_s15 = smov 0  }
   0x5   :  { %s1073_s16 = smov 0   ;;  %s1075_s17 = smov 0  }
   0x6   :  { %s1077_s18 = smov 0   ;;  %s1079_s19 = smov 0  }
   0x7   :  { %s1081_s20 = smov 0   ;;  %s1083_s21 = smov 0  }
   0x8   :  { %s1085_s22 = smov 0  }
   0x9 LB: > { %1290 = sst [smem:[#allocation10_spill]] %s1012_s17  ;;  %s701_s23 = sadd.s32 4294967295, %s1032_s22   ;;  %s1032_s22 = sphi %s1085_s22, %s19_s22   ;;  %s1028_s21 = sphi %s1083_s21, %s1304_s21   ;;  %s1024_s20 = sphi %s1081_s20, %s1311_s20   ;;  %s1020_s19 = sphi %s1079_s19, %s1302_s19   ;;  %s1016_s18 = sphi %s1077_s18, %s1310_s18   ;;  %s1012_s17 = sphi %s1075_s17, %s1301_s17   ;;  %s1008_s16 = sphi %s1073_s16, %s1309_s16   ;;  %s1004_s15 = sphi %s1071_s15, %s1308_s15   ;;  %s1000_s14 = sphi %s1069_s14, %s1307_s14   ;;  %s996_s13 = sphi %s1067_s13, %s1306_s13   ;;  %s992_s12 = sphi %s1065_s12, %s1305_s12  }
   0xa   : > { %1291 = sst [smem:[#allocation11_spill]] %s1028_s21  ;;  %s702_s24 = sadd.s32 4294967294, %s1032_s22  }
   0xb   : > { %s28_s25 = sadd.s32 1, %s1024_s20  ;;  %s31_s26 = sadd.s32 1, %s1028_s21 }
   0xc   : > { %p29_p0 = scmp.ge.s32.totalorder %s28_s25, 2  ;;  %s40_s27 = sadd.s32 1, %s1012_s17 }
   0xd   : > { %p47_p1 = scmp.ne.s32.totalorder %s1012_s17, %s1008_s16  ;;  %p48_p2 = scmp.eq.s32.totalorder %s1032_s22, 0 }
   0xe   : > { %s1313_s25 = smov (%p29_p0, %s28_s25), 0  ;;  %s1315_s26 = smov (!%p29_p0, %s31_s26), %s1028_s21 }
   0xf   : > { %1292 = sst [smem:[#allocation12_spill]] %s1313_s25  ;;  %s36_s28 = ssub.s32 %s1024_s20, %s1313_s25 }
  0x10   : > { %p1131_p3 = por %p48_p2, %p47_p1  ;;  %p33_p4 = scmp.ge.s32.totalorder %s1315_s26, 2 }
  0x11   : > { %p53_p5 = scmp.ne.s32.totalorder %s1008_s16, %s1004_s15  ;;  %p54_p6 = scmp.eq.s32.totalorder %s701_s23, 0 }
  0x12   : > { %s108_s30 = sadd.s32 1, %s1000_s14  ;;  %s1317_s26 = smov (%p33_p4, %s1315_s26), 0 }
  0x13   : > { %1294 = sst [smem:[#allocation13_spill]] %s1317_s26  ;;  %p1139_p7 = por %p54_p6, %p53_p5 }
  0x14   : > { %p118_p8 = scmp.ne.s32.totalorder %s1000_s14, %s996_s13  ;;  %s35_s5 = ssub.s32 %s1028_s21, %s1317_s26 }
  0x15   : > { %p119_p9 = scmp.eq.s32.totalorder %s701_s23, 3  ;;  %s37_s6 = sor.u32 %s36_s28, %s35_s5 }
  0x16   : > { %p106_p10 = scmp.eq.s32.totalorder %s35_s5, 0  ;;  %p38_p11 = scmp.eq.s32.totalorder %s37_s6, 0 }
  0x17   : > { %p1147_p12 = por %p119_p9, %p118_p8  ;;  %p124_p13 = scmp.ne.s32.totalorder %s996_s13, %s992_s12 }
  0x18   : > { %s1152_s8 = scalar_select %p106_p10, %s1000_s14, %s108_s30  }
  0x19   : > { %s1155_s9 = scalar_select %p38_p11, %s1012_s17, %s40_s27  }
  0x1a   : > { %p125_p0 = scmp.eq.s32.totalorder %s702_s24, 3  ;;  %p767_p1 = scmp.lt.s32.totalorder %s1032_s22, 4 }
  0x1b   : > { %1297 = sst [smem:[#allocation14_spill]] %s1155_s9  ;;  %s151_s11 = sand.u32 1, %s1012_s17  }
  0x1c   : > { %p1160_p2 = por %p125_p0, %p124_p13  ;;  %s705_s15 = sshll.u32 %s151_s11, 6 }
  0x1d   : > { %s706_s23 = sshll.u32 %s1024_s20, 1  ;;  %s707_s28 = sshll.u32 %s1028_s21, 4 }
  0x1e   : > { %s155_s5 = scalar_lea.vmem [#allocation4], %s705_s15  ;;  %s161_s26 = sadd.s32 %s707_s28, %s706_s23 }
  0x1f   : > { %s164_s6 = sshll.u32 %s155_s5, 4  ;;  %s708_s30 = sshll.u32 %s161_s26, 7  ;;  %s165_s6 = int_to_ptr.vmem [resolvable:$true] %s164_s6 }
  0x20   : > { %p1169_p4 = pnand %p767_p1, %p1131_p3  ;;  %s163_s9 = scalar_lea.hbm %s1282_s0, %s708_s30 }
  0x21   : > { %p709_p5 = scmp.ge.s32.totalorder %s1032_s22, 1  ;;  %s152_s17 = scalar_lea.sflag [#allocation5], %s151_s11 }
  0x22   : > { %p886_p6 = pneg %p1169_p4  ;;  %s897_s21 = scalar_lea.vmem %s165_s6, 1024 }
  0x23   : > { %p898_p8 = scmp.ne.s32.totalorder %s165_s6, %s897_s21  ;;  %s1034_s15 = smov [#allocation4]  }
  0x24   : > { %s902_s26 = sshll.u32 %s1034_s15, 4  ;;  %s903_s26 = int_to_ptr.vmem [resolvable:$false] %s902_s26 }
  0x25   : > { %p900_p9 = pnand %p898_p8, %p886_p6  ;;  %s904_s29 = scalar_lea.vmem %s903_s26, 2048 }
  0x26   : > { %p905_p3 = scmp.lt.s32.totalorder %s165_s6, %s903_s26  ;;  %p906_p11 = scmp.lt.s32.totalorder %s904_s29, %s897_s21 }
  0x27   : > { %p901_p10 = pneg %p900_p9 }
  0x28   : > { %p907_p13 = por %p906_p11, %p905_p3 }
  0x2a   : > { %p908_p0 = pnand %p907_p13, %p901_p10 }
  0x2c   : > { %911 = shalt.err (!%p908_p0)
}
  0x2d   : > { %s1035_s25 = smov 512   ;;  %s1036_s11 = smov 256  }
  0x2e   : > { %s1037_s23 = smov 16   ;;  %p172_p1 = scmp.lt.s32.totalorder %s1032_s22, 5 }
  0x2f   : > { %762 = dma.hbm_to_vmem [thread:$0]  (!%p1169_p4), %s163_s9, 1024, %s165_s6, %s152_s17, %s1035_s25, %s1036_s11, %s1037_s23  }
  0x30   : > { %p173_p6 = pnand %p709_p5, %p172_p1 }
  0x31   : > { %s178_s28 = sand.u32 (!%p173_p6), 1, %s1008_s16  }
  0x32   : > { %176 = sbr.rel (%p173_p6) target bundleno = 946 (0x3b2), region = 32  ;;  %s710_s5 = sshll.u32 (!%p173_p6), %s178_s28, 6 }
  0x33   : > { %s179_s21 = scalar_lea.sflag (!%p173_p6), [#allocation5], %s178_s28  ;;  %s1185_s30 = scalar_lea.vmem (!%p173_p6), [#allocation4], %s710_s5 }
  0x37   : > { %983 = dma.done.wait (%p1139_p7), %s179_s21, 1024  }
  0x38   : > { %985 = vsyncadd (%p1139_p7), %s179_s21, 4294966272  ;;  %s202_s27 = sand.u32 1, %s996_s13   ;;  %p711_p4 = scmp.ne.s32.totalorder %s1016_s18, 0 }
  0x39   : > { %s1194_s17 = scalar_lea.vmem [#allocation7], %s202_s27 }
  0x3a   : > { %208 = sbr.rel (%p711_p4) target bundleno = 72 (0x48), region = 40 }
  0x3f   : > { %v1038_v0 = vmov 0.0   ;;  %v1039_v1 = vmov -inf  }
  0x40   : > { %209 = vst [vmem:[#allocation2 + $0x30] sm:$0xff] %v1038_v0  ;;  %210 = vst [vmem:[#allocation2] sm:$0xff] %v1038_v0 }
  0x41   : > { %211 = vst [vmem:[#allocation2 + $0x18] sm:$0xff] %v1038_v0  ;;  %212 = vst [vmem:[#allocation2 + $0x10] sm:$0xff] %v1038_v0 }
  0x42   : > { %213 = vst [vmem:[#allocation2 + $0x8] sm:$0xff] %v1038_v0  ;;  %214 = vst [vmem:[#allocation2 + $0x20] sm:$0xff] %v1038_v0 }
  0x43   : > { %215 = vst [vmem:[#allocation2 + $0x28] sm:$0xff] %v1038_v0  ;;  %216 = vst [vmem:[#allocation2 + $0x38] sm:$0xff] %v1038_v0 }
  0x44   : > { %217 = vst [vmem:[#allocation3] sm:$0xff] %v1039_v1  ;;  %218 = vst [vmem:[#allocation3 + $0x18] sm:$0xff] %v1039_v1 }
  0x45   : > { %219 = vst [vmem:[#allocation3 + $0x10] sm:$0xff] %v1039_v1  ;;  %220 = vst [vmem:[#allocation3 + $0x20] sm:$0xff] %v1039_v1 }
  0x46   : > { %221 = vst [vmem:[#allocation3 + $0x28] sm:$0xff] %v1039_v1  ;;  %222 = vst [vmem:[#allocation3 + $0x8] sm:$0xff] %v1039_v1 }
  0x47   : > { %223 = vst [vmem:[#allocation3 + $0x30] sm:$0xff] %v1039_v1  ;;  %224 = vst [vmem:[#allocation3 + $0x38] sm:$0xff] %v1039_v1 }
  0x48 PF: > { %v225_v2 = vld [vmem:[#allocation2 + $0x30] sm:$0xff]  ;;  %v243_v3 = vld [vmem:[%s1185_s30] sm:$0xff]  ;;  %v227_v7 = vld [vmem:[#allocation2 + $0x18] sm:$0xff]  ;;  %p712_p7 = scmp.ne.s32.totalorder %s1016_s18, 1 }
  0x49   : > { %v226_v4 = vld [vmem:[#allocation2] sm:$0xff]  ;;  %v251_v5 = vadd.f32 %v243_v3, %v225_v2  ;;  %v244_v6 = vld [vmem:[%s1185_s30 + $0x10] sm:$0xff]  ;;  %v230_v13 = vld [vmem:[#allocation2 + $0x8] sm:$0xff]  ;;  %s1042_s23 = smov (!%p712_p7), 127  }
  0x4a   : > { %v245_v8 = vld [vmem:[%s1185_s30 + $0x20] sm:$0xff]  ;;  %v252_v9 = vadd.f32 %v244_v6, %v226_v4  ;;  %v228_v11 = vld [vmem:[#allocation2 + $0x10] sm:$0xff]  ;;  %v247_v15 = vld [vmem:[%s1185_s30 + $0x8] sm:$0xff] }
  0x4b   : > { %v253_v10 = vadd.f32 %v245_v8, %v227_v7  ;;  %v246_v12 = vld [vmem:[%s1185_s30 + $0x30] sm:$0xff]  ;;  %267 = vst [vmem:[#allocation2 + $0x30] sm:$0xff] %v251_v5  ;;  %v231_v16 = vld [vmem:[#allocation2 + $0x20] sm:$0xff]  ;;  %v248_v17 = vld [vmem:[%s1185_s30 + $0x18] sm:$0xff]  ;;  %v259_v18 = vadd.f32 %v247_v15, %v230_v13 }
  0x4c   : > { %v254_v14 = vadd.f32 %v246_v12, %v228_v11  ;;  %268 = vst [vmem:[#allocation2] sm:$0xff] %v252_v9  ;;  %v260_v19 = vadd.f32 %v248_v17, %v231_v16  ;;  %v232_v20 = vld [vmem:[#allocation2 + $0x28] sm:$0xff]  ;;  %v233_v22 = vld [vmem:[#allocation2 + $0x38] sm:$0xff]  ;;  %v234_v25 = vld [vmem:[#allocation3] sm:$0xff] }
  0x4d   : > { %269 = vst [vmem:[#allocation2 + $0x18] sm:$0xff] %v253_v10  ;;  %v249_v21 = vld [vmem:[%s1185_s30 + $0x28] sm:$0xff]  ;;  %v250_v24 = vld [vmem:[%s1185_s30 + $0x38] sm:$0xff]  ;;  %271 = vst [vmem:[#allocation2 + $0x8] sm:$0xff] %v259_v18  ;;  %v255_v28 = vmax.f32 %v234_v25, %v243_v3 }
  0x4e   : > { %270 = vst [vmem:[#allocation2 + $0x10] sm:$0xff] %v254_v14  ;;  %v261_v23 = vadd.f32 %v249_v21, %v232_v20  ;;  %v235_v26 = vld [vmem:[#allocation3 + $0x18] sm:$0xff]  ;;  %272 = vst [vmem:[#allocation2 + $0x20] sm:$0xff] %v260_v19  ;;  %v262_v27 = vadd.f32 %v250_v24, %v233_v22  ;;  %v236_v30 = vld [vmem:[#allocation3 + $0x10] sm:$0xff] }
  0x4f   : > { %v256_v29 = vmax.f32 %v235_v26, %v244_v6  ;;  %v237_v31 = vld [vmem:[#allocation3 + $0x20] sm:$0xff]  ;;  %v239_v32 = vld [vmem:[#allocation3 + $0x28] sm:$0xff]  ;;  %v257_v33 = vmax.f32 %v236_v30, %v245_v8  ;;  %v241_v37 = vld [vmem:[#allocation3 + $0x30] sm:$0xff]  ;;  %275 = vst [vmem:[#allocation3] sm:$0xff] %v255_v28 }
  0x50   : > { %273 = vst [vmem:[#allocation2 + $0x28] sm:$0xff] %v261_v23  ;;  %v258_v34 = vmax.f32 %v237_v31, %v246_v12  ;;  %v263_v35 = vmax.f32 %v239_v32, %v247_v15  ;;  %v240_v36 = vld [vmem:[#allocation3 + $0x8] sm:$0xff]  ;;  %v242_v38 = vld [vmem:[#allocation3 + $0x38] sm:$0xff]  ;;  %274 = vst [vmem:[#allocation2 + $0x38] sm:$0xff] %v262_v27  ;;  %v265_v40 = vmax.f32 %v241_v37, %v249_v21  ;;  %286 = sbr.rel (%p712_p7) target bundleno = 923 (0x39b), region = 44 }
  0x51   : > { %276 = vst [vmem:[#allocation3 + $0x18] sm:$0xff] %v256_v29  ;;  %v264_v39 = vmax.f32 %v240_v36, %v248_v17  ;;  %v266_v41 = vmax.f32 %v242_v38, %v250_v24  ;;  %277 = vst [vmem:[#allocation3 + $0x10] sm:$0xff] %v257_v33 }
  0x52   : > { %278 = vst [vmem:[#allocation3 + $0x20] sm:$0xff] %v258_v34  ;;  %279 = vst [vmem:[#allocation3 + $0x28] sm:$0xff] %v263_v35 }
  0x53   : > { %280 = vst [vmem:[#allocation3 + $0x8] sm:$0xff] %v264_v39  ;;  %281 = vst [vmem:[#allocation3 + $0x30] sm:$0xff] %v265_v40 }
  0x54   : > { %282 = vst [vmem:[#allocation3 + $0x38] sm:$0xff] %v266_v41 }
  0x55   : > { %v290_v44 = vld [vmem:[#allocation2 + $0x10] sm:$0xff]  ;;  %v289_v47 = vld [vmem:[#allocation2 + $0x18] sm:$0xff]  ;;  %v288_v50 = vld [vmem:[#allocation2] sm:$0xff]  ;;  %v1040_v2 = vmov 0.0   ;;  %vm1041_vm0 = vmmov 0   ;;  %vm331_vm1 = vcmask 7168  }
  0x56   : > { %v292_v51 = vld [vmem:[#allocation2 + $0x20] sm:$0xff]  ;;  %v287_v54 = vld [vmem:[#allocation2 + $0x30] sm:$0xff]  ;;  %v291_v55 = vld [vmem:[#allocation2 + $0x8] sm:$0xff]  ;;  %736 = vmatprep.subr.mxu0 %v1040_v2  ;;  %744 = vmatprep.mubr.msk.f32.mxu0 %vm1041_vm0, %v1040_v2  ;;  %vm337_vm2 = vcmask 261120   ;;  %vm416_vm3 = vcmask 15360   ;;  %vm429_vm4 = vcmask 1041408  }
  0x57   : > { %v294_v46 = vld [vmem:[#allocation2 + $0x38] sm:$0xff]  ;;  %v293_v48 = vld [vmem:[#allocation2 + $0x28] sm:$0xff]  ;;  %v296_v52 = vadd.f32 %v292_v51, %v288_v50  ;;  %v295_v58 = vadd.f32 %v291_v55, %v287_v54  ;;  %v311_v60 = vld [vmem:[#allocation3] sm:$0xff]  ;;  %v1043_v31 = vmov 0   ;;  %vm589_vm5 = vcmask 130112  }
  0x58   : > { %v298_v49 = vadd.f32 %v294_v46, %v290_v44  ;;  %v297_v53 = vadd.f32 %v293_v48, %v289_v47  ;;  %v313_v56 = vld [vmem:[#allocation3 + $0x10] sm:$0xff]  ;;  %v312_v62 = vld [vmem:[#allocation3 + $0x18] sm:$0xff]  ;;  %v336_v18 = vld [vmem:[%s1283_s1] sm:$0x3]  ;;  %866 = vset.pattern.permute.xlu1 %v1043_v31  ;;  %867 = vset.pattern.permute.xlu0 %v1043_v31  ;;  %vm596_vm6 = vcmask 195712   ;;  %vm603_vm7 = vcmask 261312  }
  0x59   : > { %v314_v42 = vld [vmem:[#allocation3 + $0x20] sm:$0xff]  ;;  %v315_v61 = vld [vmem:[#allocation3 + $0x28] sm:$0xff]  ;;  %v414_v25 = vld [vmem:[%s1284_s2 + $0x10] sm:$0xff]  ;;  %vm606_vm8 = vcmask 253952  }
  0x5a   : > { %305 = vadd.xlane.f32.xlu0 %v298_v49  ;;  %v317_v57 = vld [vmem:[#allocation3 + $0x30] sm:$0xff]  ;;  %v316_v63 = vld [vmem:[#allocation3 + $0x8] sm:$0xff]  ;;  %v319_v0 = vmax.f32 %v311_v60, %v315_v61  ;;  %v412_v20 = vld [vmem:[%s1284_s2] sm:$0xff] }
  0x5b   : > { %v318_v43 = vld [vmem:[#allocation3 + $0x38] sm:$0xff]  ;;  %v321_v59 = vmax.f32 %v313_v56, %v317_v57  ;;  %v320_v1 = vmax.f32 %v312_v62, %v316_v63  ;;  %749 = vmatprep.mubr.msk.f32.mxu1 %vm416_vm3, %v412_v20  ;;  %v413_v24 = vld [vmem:[%s1284_s2 + $0x8] sm:$0xff]  ;;  %v578_v56 = vlaneseq }
  0x5c   : > { %v322_v45 = vmax.f32 %v314_v42, %v318_v43  ;;  %v415_v26 = vld [vmem:[%s1284_s2 + $0x18] sm:$0xff] }
  0x5d   : > { %v579_v57 = vand.u32 127, %v578_v56 }
  0x5e   : > { %329 = vmax.xlane.f32.xlu1 %v322_v45  ;;  %303 = vadd.xlane.f32.xlu0 %v297_v53 }
  0x5f   : > { %v584_v60 = vadd.s32 4294967288, %v579_v57  ;;  %v598_v63 = vadd.s32 4294967272, %v579_v57 }
  0x62   : > { %301 = vadd.xlane.f32.xlu1 %v296_v52  ;;  %327 = vmax.xlane.f32.xlu0 %v321_v59  ;;  %v581_v59 = vshrl.u32 %v578_v56, 7 }
  0x64   : > { %v582_v62 = vsub.s32 %v579_v57, %v581_v59 }
  0x66   : > { %299 = vadd.xlane.f32.xlu1 %v295_v58  ;;  %325 = vmax.xlane.f32.xlu0 %v320_v1  ;;  %v591_v58 = vadd.s32 4294967280, %v579_v57 }
  0x68   : > { %v594_v1 = vsub.s32 %v591_v58, %v581_v59 }
  0x6a   : > { %323 = vmax.xlane.f32.xlu1 %v319_v0 }
  0xe3   : > { %v306_v4 = vpop.xlane.xlu0 %305 }
  0xe4   : > { %v310_v5 = vmul.f32 0.001953125, %v306_v4 }
  0xe7   : > { %v330_v3 = vpop.xlane.xlu1 %329  ;;  %v304_v8 = vpop.xlane.xlu0 %303 }
  0xe8   : > { %v335_v6 = vsel %vm331_vm1, %v310_v5, %v330_v3  ;;  %v309_v9 = vmul.f32 0.001953125, %v304_v8  ;;  %v601_v5 = vsub.s32 %v598_v63, %v581_v59 }
  0xe9   : > { %737 = vmatpush3.msra.mxu0 %v335_v6 }
  0xea   : > { %738 = vmatprep.subr.mxu0 %v1040_v2 }
  0xeb   : > { %v302_v7 = vpop.xlane.xlu1 %301  ;;  %v328_v11 = vpop.xlane.xlu0 %327 }
  0xec   : > { %v334_v12 = vsel %vm331_vm1, %v309_v9, %v328_v11  ;;  %v308_v13 = vmul.f32 0.001953125, %v302_v7 }
  0xed   : > { %739 = vmatpush3.msra.mxu0 %v334_v12 }
  0xee   : > { %740 = vmatprep.subr.mxu0 %v1040_v2 }
  0xef   : > { %v300_v10 = vpop.xlane.xlu1 %299  ;;  %v326_v15 = vpop.xlane.xlu0 %325 }
  0xf0   : > { %v307_v14 = vmul.f32 0.001953125, %v300_v10  ;;  %v333_v17 = vsel %vm331_vm1, %v308_v13, %v326_v15 }
  0xf1   : > { %741 = vmatpush3.msra.mxu0 %v333_v17 }
  0xf2   : > { %742 = vmatprep.subr.mxu0 %v1040_v2  ;;  %v587_v2 = vsub.s32 %v584_v60, %v581_v59 }
  0xf3   : > { %v324_v16 = vpop.xlane.xlu1 %323 }
  0xf4   : > { %v332_v19 = vsel %vm331_vm1, %v307_v14, %v324_v16 }
  0xf5   : > { %743 = vmatpush3.msra.mxu0 %v332_v19 }
  0xf6   : > { %745 = vmatmul.mubr.msk.f32.vlgmr.msra.gmra.mxu0 %vm337_vm2, %v336_v18 }
 0x1b6   : > { %v407_v21 = vpop.f32.mrf.mxu0 }
 0x1b7   : > { %v411_v22 = vmax.f32 %v407_v21, 0.0 }
 0x1b8   : > { %v746_v23 = vpop.f32.mrf.mxu0 }
 0x1b9   : > { %747 = vmatprep.subr.msk.mxu1 %vm429_vm4, %v411_v22 }
 0x1ba   : > { %748 = vmatpush3.msk.msra.mxu1 %vm429_vm4, %v411_v22 }
 0x1bb   : > { %750 = vmatmul.mubr.msk.f32.vlgmr.msra.gmra.mxu1 %vm416_vm3, %v413_v24 }
 0x1bc   : > { %752 = vmatprep.mubr.msk.f32.mxu1 %vm416_vm3, %v414_v25 }
 0x1bf   : > { %753 = vmatmul.mubr.msk.f32.gmra.mxu1 %vm416_vm3, %v415_v26 }
 0x27b   : > { %v751_v27 = vpop.f32.mrf.mxu1 }
 0x27c   : > { %524 = vrot.lane.b32.xlu1 %v751_v27, %s1042_s23 }
 0x27d   : > { %v499_v28 = vpop.f32.mrf.mxu1 }
 0x27e   : > { %522 = vrot.lane.b32.xlu0 %v499_v28, %s1042_s23 }
 0x27f   : > { %v754_v29 = vpop.f32.mrf.mxu1 }
 0x281   : > { %v509_v30 = vpop.f32.mrf.mxu1 }
 0x282   : > { %526 = vrot.lane.b32.xlu1 %v509_v30, %s1042_s23 }
 0x286   : > { %528 = vrot.lane.b32.xlu1 %v754_v29, %s1042_s23 }
 0x2ee   : > { %v525_v32 = vpop.permute.xlu1 %524 }
 0x2ef   : > { %v535_v33 = vadd.f32 %v751_v27, %v525_v32 }
 0x2f0   : > { %v523_v34 = vpop.permute.xlu0 %522 }
 0x2f1   : > { %v720_v35 = vmul.f32 -1.442695, %v535_v33  ;;  %v534_v36 = vadd.f32 %v523_v34, %v499_v28 }
 0x2f3   : > { %868 = vpow2.f32 %v720_v35  ;;  %v719_v37 = vmul.f32 -1.442695, %v534_v36 }
 0x2f4   : > { %v527_v38 = vpop.permute.xlu1 %526 }
 0x2f5   : > { %870 = vpow2.f32 %v719_v37  ;;  %v536_v39 = vadd.f32 %v527_v38, %v509_v30 }
 0x2f7   : > { %v721_v40 = vmul.f32 -1.442695, %v536_v39 }
 0x2f8   : > { %v529_v41 = vpop.permute.xlu1 %528 }
 0x2f9   : > { %872 = vpow2.f32 %v721_v40  ;;  %v537_v42 = vadd.f32 %v754_v29, %v529_v41 }
 0x2fb   : > { %v722_v43 = vmul.f32 -1.442695, %v537_v42 }
 0x2fd   : > { %874 = vpow2.f32 %v722_v43 }
 0x300   : > { %v869_v44 = vpop.eup %868 }
 0x301   : > { %v551_v45 = vadd.f32 1.0, %v869_v44 }
 0x302   : > { %v871_v46 = vpop.eup %870 }
 0x303   : > { %876 = vrcp.f32 %v551_v45  ;;  %v550_v47 = vadd.f32 1.0, %v871_v46 }
 0x305   : > { %878 = vrcp.f32 %v550_v47 }
 0x306   : > { %v873_v48 = vpop.eup %872 }
 0x307   : > { %v552_v49 = vadd.f32 1.0, %v873_v48 }
 0x309   : > { %880 = vrcp.f32 %v552_v49 }
 0x30a   : > { %v875_v50 = vpop.eup %874 }
 0x30b   : > { %v553_v51 = vadd.f32 1.0, %v875_v50 }
 0x30d   : > { %882 = vrcp.f32 %v553_v51 }
 0x310   : > { %v877_v52 = vpop.eup %876 }
 0x311   : > { %570 = vperm.xlu1 %866, %v877_v52  }
 0x312   : > { %v879_v53 = vpop.eup %878 }
 0x313   : > { %567 = vperm.xlu0 %867, %v879_v53  }
 0x316   : > { %v881_v54 = vpop.eup %880 }
 0x317   : > { %573 = vperm.xlu1 %866, %v881_v54  }
 0x31a   : > { %v883_v55 = vpop.eup %882 }
 0x31b   : > { %576 = vperm.xlu0 %867, %v883_v55  }
 0x38c   : > { %v571_v61 = vpop.permute.xlu1 %570 }
 0x38d   : > { %v588_v7 = vrot.slane %v571_v61, %v587_v2 }
 0x38e   : > { %v568_v0 = vpop.permute.xlu0 %567 }
 0x38f   : > { %v583_v4 = vrot.slane %v568_v0, %v582_v62 }
 0x391   : > { %v590_v9 = vsel %vm589_vm5, %v588_v7, %v583_v4 }
 0x392   : > { %v574_v3 = vpop.permute.xlu1 %573 }
 0x393   : > { %v595_v6 = vrot.slane %v574_v3, %v594_v1 }
 0x395   : > { %v597_v11 = vsel %vm596_vm6, %v595_v6, %v590_v9 }
 0x396   : > { %v577_v8 = vpop.permute.xlu0 %576 }
 0x397   : > { %v602_v10 = vrot.slane %v577_v8, %v601_v5 }
 0x399   : > { %v604_v12 = vsel %vm603_vm7, %v602_v10, %v597_v11 }
 0x39a   : > { %607 = vst.msk [vmem:[%s1194_s17] sm:$0x1] %vm606_vm8, %v604_v12 }
 0x39b PF: > { %s723_s28 = sshll.u32 %s1020_s19, 4  ;;  %s621_s18 = sshll.u32 %s1194_s17, 4  ;;  %s622_s18 = int_to_ptr.vmem [resolvable:$true] %s621_s18 }
 0x39c   : > { %s619_s30 = scalar_lea.hbm %s1285_s3, %s723_s28  ;;  %s609_s4 = scalar_lea.sflag [#allocation6], %s202_s27 }
 0x39d   : > { %s912_s9 = scalar_lea.vmem %s622_s18, 16  ;;  %s1044_s6 = smov [#allocation7]  }
 0x39e   : > { %p913_p5 = scmp.ne.s32.totalorder %s622_s18, %s912_s9  ;;  %s916_s24 = sshll.u32 %s1044_s6, 4  ;;  %s917_s24 = int_to_ptr.vmem [resolvable:$false] %s916_s24 }
 0x39f   : > { %s918_s15 = scalar_lea.vmem %s917_s24, 32  ;;  %p919_p10 = scmp.lt.s32.totalorder %s622_s18, %s917_s24 }
 0x3a0   : > { %p914_p8 = pnand %p913_p5, %p1147_p12  ;;  %p920_p3 = scmp.lt.s32.totalorder %s918_s15, %s912_s9 }
 0x3a2   : > { %p915_p9 = pneg %p914_p8  ;;  %p921_p11 = por %p920_p3, %p919_p10 }
 0x3a4   : > { %p922_p13 = pnand %p921_p11, %p915_p9 }
 0x3a6   : > { %925 = shalt.err (!%p922_p13)
}
 0x3a7   : > { %s926_s19 = scalar_lea.hbm %s619_s30, 16  ;;  %s930_s26 = scalar_lea.hbm %s1285_s3, 32 }
 0x3a8   : > { %p927_p0 = scmp.ne.s32.totalorder %s619_s30, %s926_s19  ;;  %p931_p4 = scmp.lt.s32.totalorder %s619_s30, %s1285_s3 }
 0x3a9   : > { %p932_p7 = scmp.lt.s32.totalorder %s930_s26, %s926_s19 }
 0x3aa   : > { %p928_p1 = pnand %p927_p0, %p1147_p12 }
 0x3ab   : > { %p933_p5 = por %p932_p7, %p931_p4 }
 0x3ac   : > { %p929_p6 = pneg %p928_p1 }
 0x3ae   : > { %p934_p8 = pnand %p933_p5, %p929_p6 }
 0x3b0   : > { %937 = shalt.err (!%p934_p8)
}
 0x3b1   : > { %757 = dma.vmem_to_hbm [thread:$0]  (%p1147_p12), %s622_s18, 16, %s619_s30, %s609_s4  }
 0x3b2 PF: > { %p768_p9 = scmp.ge.s32.totalorder %s1032_s22, 2  ;;  %s633_s11 = sand.u32 1, %s992_s12  }
 0x3b3   : > { %s634_s23 = scalar_lea.sflag [#allocation6], %s633_s11 }
 0x3b4   : > { %p764_p10 = pnand %p768_p9, %p1160_p2 }
 0x3b6   : > { %p765_p3 = pneg %p764_p10 }
 0x3b8   : > { %987 = dma.done.wait (%p765_p3), %s634_s23, 16  }
 0x3b9   : > { %989 = vsyncadd (%p765_p3), %s634_s23, 4294967280  ;;  %s19_s22 = sadd.s32 1, %s1032_s22   ;;  %s1300_s7 = sld [smem:[#allocation10_spill]] }
 0x3ba   : > { %p16_p11 = scmp.ge.s32.totalorder %s19_s22, 6   ;;  %s1301_s17 = sld [smem:[#allocation14_spill]] }
 0x3bb   : > { %s1302_s19 = sld [smem:[#allocation11_spill]]  ;;  %s1305_s12 = smov %s996_s13 }
 0x3bc   : > { %s1303_s28 = sld [smem:[#allocation12_spill]]  ;;  %s1306_s13 = smov %s1000_s14 }
 0x3bd   : > { %s1304_s21 = sld [smem:[#allocation13_spill]]  ;;  %s1307_s14 = smov %s1152_s8 }
 0x3be   : > { %s1308_s15 = smov %s1008_s16  ;;  %s1310_s18 = smov %s1024_s20 }
 0x3bf   : > { %s1309_s16 = smov %s1300_s7  ;;  %18 = sbr.rel (!%p16_p11) target bundleno = 9 (0x9), region = 87 }
 0x3c2   : > { %s1311_s20 = smov %s1303_s28 }
 0x3c4   :  { %638 = vsyncpa [#allocation5], 1 }
 0x3c5   :  { %640 = vsyncpa [#allocation5 + $0x1], 1 }
 0x3c6   :  { %641 = vsyncpa [#allocation6], 1 }
 0x3c7   :  { %643 = vsyncpa [#allocation6 + $0x1], 1 }

</bundles_post_ra>
